<compile_context>
chip_gen: v7x
topology: tpu7x:2x2x1
jax: 0.10.0
libtpu: 0.0.40
codegen_flags: <defaults>
</compile_context>

<pallas_src>
import jax
import jax.numpy as jnp
from jax.experimental import pallas as pl
from jax.experimental.pallas import tpu as pltpu

LN_EPS = 1e-5  # PyTorch nn.LayerNorm default eps


def _round_up(x, m):
    return (x + m - 1) // m * m


def _layernorm_fused(h, gamma, beta):
    """One-pass LayerNorm: var = max(E[x^2] - mean^2, 0), gamma folded into scale."""
    n = h.shape[-1]
    inv_n = 1.0 / n
    mean = jnp.sum(h, axis=-1, keepdims=True) * inv_n
    ex2 = jnp.sum(h * h, axis=-1, keepdims=True) * inv_n
    var = jnp.maximum(ex2 - mean * mean, 0.0)           # clamp f32 cancellation
    scale = jax.lax.rsqrt(var + LN_EPS) * gamma          # (B,1)*(1,N) -> (B,N)
    return h * scale + (beta - mean * scale)


def actor_kernel(x_ref, w1_ref, w23_ref, v_ref, out_ref):
    """x tile (TB,S); w1 (S,H1) bf16; w23 = [w2;w3_pad] (H1+H2,H2) bf16;
    v = [b1;g1;be1;b2;g2;be2;b3;0] (8,H1) f32; out (TB,A_out)."""
    h1_dim = w1_ref.shape[1]       # 256
    h2_dim = w23_ref.shape[1]      # 128

    x = x_ref[...].astype(jnp.bfloat16)

    # fc1 -> LayerNorm(256) -> ReLU
    h1 = jnp.dot(x, w1_ref[...], preferred_element_type=jnp.float32)
    h1 = h1 + v_ref[0:1, :]
    h1 = _layernorm_fused(h1, v_ref[1:2, :], v_ref[2:3, :])
    h1 = jnp.maximum(h1, 0.0)

    # fc2 -> LayerNorm(128) -> ReLU   (w2 = top H1 rows of the packed w23)
    h2 = jnp.dot(h1.astype(jnp.bfloat16), w23_ref[0:h1_dim, :],
                 preferred_element_type=jnp.float32)
    h2 = h2 + v_ref[3:4, 0:h2_dim]
    h2 = _layernorm_fused(h2, v_ref[4:5, 0:h2_dim], v_ref[5:6, 0:h2_dim])
    h2 = jnp.maximum(h2, 0.0)

    # fc3 -> tanh   (w3 = bottom H2 rows of w23, columns padded to h2_dim)
    h3 = jnp.dot(h2.astype(jnp.bfloat16), w23_ref[h1_dim:, :],
                 preferred_element_type=jnp.float32)
    h3 = h3 + v_ref[6:7, 0:h2_dim]
    a_out = out_ref.shape[-1]                            # A_out (<= h2_dim)
    out_ref[...] = jnp.tanh(h3[:, :a_out]).astype(out_ref.dtype)


def actor_forward(state, params, *, max_batch_tile=1024, out_dtype=jnp.float32):
    (w1, b1, g1, be1, w2, b2, g2, be2, w3, b3) = params
    B, S = state.shape
    H1 = w1.shape[1]   # 256
    H2 = w2.shape[1]   # 128
    A = w3.shape[1]

    assert max_batch_tile % 8 == 0
    # Packing layout assumes action_size <= 128 <= 256 (true for this Actor).
    assert A <= H2 <= H1, "operand packing assumes action_size <= 128 <= 256"

    # ---- batch tiling -------------------------------------------------------
    if B <= max_batch_tile:
        Bp = B
        # Two even tiles when feasible so v7x's two TensorCores both run.
        tb = B // 2 if (B >= 256 and B % 16 == 0) else B
    else:
        tb = max_batch_tile
        Bp = _round_up(B, tb)
    nb = Bp // tb

    x = state.astype(jnp.float32)
    if Bp != B:                      # gate the pad: it is a full extra HBM pass
        x = jnp.pad(x, ((0, Bp - B), (0, 0)))

    # ---- output lane width --------------------------------------------------
    # Small-batch latency path: lane-dense padded output (unmasked stores).
    # Large-batch throughput path: unpadded output (16x fewer write bytes).
    A_out = _round_up(A, 128) if Bp <= 1024 else A
    A_out = min(A_out, H2) if A_out != A else A_out

    # ---- pack weights / vectors into 4 DMA'd operands -----------------------
    w1b = w1.astype(jnp.bfloat16)                                   # (S, H1)
    w3p = jnp.pad(w3, ((0, 0), (0, H2 - A)))                        # (H2, H2)
    w23 = jnp.concatenate([w2, w3p], axis=0).astype(jnp.bfloat16)   # (H1+H2, H2)

    def padrow(v):
        return jnp.pad(v.astype(jnp.float32), (0, H1 - v.shape[0]))

    vpack = jnp.stack(
        [padrow(b1), padrow(g1), padrow(be1),
         padrow(b2), padrow(g2), padrow(be2),
         padrow(b3), jnp.zeros((H1,), jnp.float32)], axis=0)        # (8, H1)

    def resident(arr):
        # Same block every grid step -> weights stay resident in VMEM.
        return pl.BlockSpec(arr.shape, lambda i: (0,) * arr.ndim)

    out = pl.pallas_call(
        actor_kernel,
        out_shape=jax.ShapeDtypeStruct((Bp, A_out), out_dtype),
        grid_spec=pltpu.PrefetchScalarGridSpec(
            num_scalar_prefetch=0,
            grid=(nb,),
            in_specs=[
                pl.BlockSpec((tb, S), lambda i: (i, 0)),
                resident(w1b),
                resident(w23),
                resident(vpack),
            ],
            out_specs=pl.BlockSpec((tb, A_out), lambda i: (i, 0)),
        ),
        compiler_params=pltpu.CompilerParams(
            dimension_semantics=("parallel",)),
    )(x, w1b, w23, vpack)

    if Bp != B or A_out != A:
        out = out[:B, :A]
    return out


def init_params(key, state_size, action_size):
    ks = jax.random.split(key, 6)
    # fc weights stored [in, out] so the kernel computes x @ W + b.
    w1 = jax.random.normal(ks[0], (state_size, 256), jnp.float32) * 0.05
    b1 = jax.random.normal(ks[1], (256,), jnp.float32) * 0.05
    w2 = jax.random.normal(ks[2], (256, 128), jnp.float32) * 0.05
    b2 = jax.random.normal(ks[3], (128,), jnp.float32) * 0.05
    w3 = jax.random.normal(ks[4], (128, action_size), jnp.float32) * 0.05
    b3 = jax.random.normal(ks[5], (action_size,), jnp.float32) * 0.05
    # LayerNorm affine params (PyTorch default init: weight=1, bias=0).
    g1 = jnp.ones((256,), jnp.float32)
    be1 = jnp.zeros((256,), jnp.float32)
    g2 = jnp.ones((128,), jnp.float32)
    be2 = jnp.zeros((128,), jnp.float32)
    return (w1, b1, g1, be1, w2, b2, g2, be2, w3, b3)


def _layernorm_ref(h, gamma, beta):
    # Standard two-pass LayerNorm (PyTorch nn.LayerNorm formula).
    mean = jnp.mean(h, axis=-1, keepdims=True)
    var = jnp.mean(jnp.square(h - mean), axis=-1, keepdims=True)
    return (h - mean) * jax.lax.rsqrt(var + LN_EPS) * gamma + beta


def actor_reference(state, params):
    # Same bf16-weight / f32-accumulate matmul numerics as the kernel, but an
    # independent two-pass LayerNorm to validate the fused one-pass LN.
    (w1, b1, g1, be1, w2, b2, g2, be2, w3, b3) = params
    w1b, w2b, w3b = (w.astype(jnp.bfloat16) for w in (w1, w2, w3))
    h = jnp.dot(state.astype(jnp.bfloat16), w1b,
                preferred_element_type=jnp.float32) + b1
    h = jnp.maximum(_layernorm_ref(h, g1, be1), 0.0)
    h = jnp.dot(h.astype(jnp.bfloat16), w2b,
                preferred_element_type=jnp.float32) + b2
    h = jnp.maximum(_layernorm_ref(h, g2, be2), 0.0)
    h = jnp.dot(h.astype(jnp.bfloat16), w3b,
                preferred_element_type=jnp.float32) + b3
    return jnp.tanh(h)


if __name__ == "__main__":
    state_size, action_size, batch = 32, 8, 2
    key = jax.random.PRNGKey(0)
    k_state, k_params = jax.random.split(key)
    state = jax.random.normal(k_state, (batch, state_size), jnp.float32)
    params = init_params(k_params, state_size, action_size)

    out = actor_forward(state, params)
    out = jax.block_until_ready(out)

    ref = actor_reference(state, params)
    assert out.shape == (batch, action_size)
    assert bool(jnp.allclose(out, ref, atol=2e-3, rtol=2e-3)), (
        float(jnp.max(jnp.abs(out - ref))))

    print("KERNEL_OK")
</pallas_src>

<mosaic_0001>
module attributes {stable_mosaic.version = 11 : i64} {
  func.func @actor_kernel(%arg0: i32, %arg1: memref<2x32xf32, #tpu.memory_space<vmem>>, %arg2: memref<32x256xbf16, #tpu.memory_space<vmem>>, %arg3: memref<384x128xbf16, #tpu.memory_space<vmem>>, %arg4: memref<8x256xf32, #tpu.memory_space<vmem>>, %arg5: memref<2x128xf32, #tpu.memory_space<vmem>>) attributes {dimension_semantics = [#tpu.dimension_semantics<parallel>], iteration_bounds = array<i64: 1>, scalar_prefetch = 0 : i64, scratch_operands = 0 : i64, tpu.core_type = #tpu.core_type<tc>, window_params = [{transform_indices = @transform_0, window_bounds = array<i64: 2, 32>}, {pipeline_mode = #tpu.pipeline_mode<synchronous>, transform_indices = @transform_1, window_bounds = array<i64: 32, 256>}, {pipeline_mode = #tpu.pipeline_mode<synchronous>, transform_indices = @transform_2, window_bounds = array<i64: 384, 128>}, {pipeline_mode = #tpu.pipeline_mode<synchronous>, transform_indices = @transform_3, window_bounds = array<i64: 8, 256>}, {transform_indices = @transform_4, window_bounds = array<i64: 2, 128>}]} {
    %c0 = arith.constant 0 : index
    %c0_0 = arith.constant 0 : index
    %0 = vector.load %arg1[%c0, %c0_0] : memref<2x32xf32, #tpu.memory_space<vmem>>, vector<2x32xf32>
    %1 = arith.truncf %0 : vector<2x32xf32> to vector<2x32xbf16>
    %c0_1 = arith.constant 0 : index
    %c0_2 = arith.constant 0 : index
    %2 = vector.load %arg2[%c0_1, %c0_2] : memref<32x256xbf16, #tpu.memory_space<vmem>>, vector<32x256xbf16>
    %cst = arith.constant dense<0.000000e+00> : vector<2x256xf32>
    %3 = tpu.matmul %1, %2, %cst {dimension_numbers = #tpu.dot_dimension_numbers<[1], [0], [0], [1], [0, 0, 1, 1], [], []>} : vector<2x32xbf16>, vector<32x256xbf16>, vector<2x256xf32> -> vector<2x256xf32>
    %c0_3 = arith.constant 0 : index
    %c0_4 = arith.constant 0 : index
    %4 = vector.load %arg4[%c0_3, %c0_4] : memref<8x256xf32, #tpu.memory_space<vmem>>, vector<1x256xf32>
    %5 = vector.broadcast %4 : vector<1x256xf32> to vector<2x256xf32>
    %6 = arith.addf %3, %5 : vector<2x256xf32>
    %c1 = arith.constant 1 : index
    %c0_5 = arith.constant 0 : index
    %7 = vector.load %arg4[%c1, %c0_5] : memref<8x256xf32, #tpu.memory_space<vmem>>, vector<1x256xf32>
    %c2 = arith.constant 2 : index
    %c0_6 = arith.constant 0 : index
    %8 = vector.load %arg4[%c2, %c0_6] : memref<8x256xf32, #tpu.memory_space<vmem>>, vector<1x256xf32>
    %cst_7 = arith.constant dense<0.000000e+00> : vector<2xf32>
    %9 = vector.multi_reduction <add>, %6, %cst_7 [1] : vector<2x256xf32> to vector<2xf32>
    %10 = vector.shape_cast %9 : vector<2xf32> to vector<2x1xf32>
    %cst_8 = arith.constant 3.906250e-03 : f32
    %11 = vector.broadcast %cst_8 : f32 to vector<2x1xf32>
    %12 = arith.mulf %10, %11 : vector<2x1xf32>
    %13 = arith.mulf %6, %6 : vector<2x256xf32>
    %cst_9 = arith.constant dense<0.000000e+00> : vector<2xf32>
    %14 = vector.multi_reduction <add>, %13, %cst_9 [1] : vector<2x256xf32> to vector<2xf32>
    %15 = vector.shape_cast %14 : vector<2xf32> to vector<2x1xf32>
    %cst_10 = arith.constant 3.906250e-03 : f32
    %16 = vector.broadcast %cst_10 : f32 to vector<2x1xf32>
    %17 = arith.mulf %15, %16 : vector<2x1xf32>
    %18 = arith.mulf %12, %12 : vector<2x1xf32>
    %19 = arith.subf %17, %18 : vector<2x1xf32>
    %cst_11 = arith.constant 0.000000e+00 : f32
    %20 = vector.broadcast %cst_11 : f32 to vector<2x1xf32>
    %21 = arith.maximumf %19, %20 : vector<2x1xf32>
    %cst_12 = arith.constant 9.99999974E-6 : f32
    %22 = vector.broadcast %cst_12 : f32 to vector<2x1xf32>
    %23 = arith.addf %21, %22 : vector<2x1xf32>
    %24 = math.rsqrt %23 : vector<2x1xf32>
    %25 = vector.broadcast %24 : vector<2x1xf32> to vector<2x256xf32>
    %26 = vector.broadcast %7 : vector<1x256xf32> to vector<2x256xf32>
    %27 = arith.mulf %25, %26 : vector<2x256xf32>
    %28 = arith.mulf %6, %27 : vector<2x256xf32>
    %29 = vector.broadcast %12 : vector<2x1xf32> to vector<2x256xf32>
    %30 = arith.mulf %29, %27 : vector<2x256xf32>
    %31 = vector.broadcast %8 : vector<1x256xf32> to vector<2x256xf32>
    %32 = arith.subf %31, %30 : vector<2x256xf32>
    %33 = arith.addf %28, %32 : vector<2x256xf32>
    %cst_13 = arith.constant 0.000000e+00 : f32
    %34 = vector.broadcast %cst_13 : f32 to vector<2x256xf32>
    %35 = arith.maximumf %33, %34 : vector<2x256xf32>
    %36 = arith.truncf %35 : vector<2x256xf32> to vector<2x256xbf16>
    %c0_14 = arith.constant 0 : index
    %c0_15 = arith.constant 0 : index
    %37 = vector.load %arg3[%c0_14, %c0_15] : memref<384x128xbf16, #tpu.memory_space<vmem>>, vector<256x128xbf16>
    %cst_16 = arith.constant dense<0.000000e+00> : vector<2x128xf32>
    %38 = tpu.matmul %36, %37, %cst_16 {dimension_numbers = #tpu.dot_dimension_numbers<[1], [0], [0], [1], [0, 0, 1, 1], [], []>} : vector<2x256xbf16>, vector<256x128xbf16>, vector<2x128xf32> -> vector<2x128xf32>
    %c3 = arith.constant 3 : index
    %c0_17 = arith.constant 0 : index
    %39 = vector.load %arg4[%c3, %c0_17] : memref<8x256xf32, #tpu.memory_space<vmem>>, vector<1x128xf32>
    %40 = vector.broadcast %39 : vector<1x128xf32> to vector<2x128xf32>
    %41 = arith.addf %38, %40 : vector<2x128xf32>
    %c4 = arith.constant 4 : index
    %c0_18 = arith.constant 0 : index
    %42 = vector.load %arg4[%c4, %c0_18] : memref<8x256xf32, #tpu.memory_space<vmem>>, vector<1x128xf32>
    %c5 = arith.constant 5 : index
    %c0_19 = arith.constant 0 : index
    %43 = vector.load %arg4[%c5, %c0_19] : memref<8x256xf32, #tpu.memory_space<vmem>>, vector<1x128xf32>
    %cst_20 = arith.constant dense<0.000000e+00> : vector<2xf32>
    %44 = vector.multi_reduction <add>, %41, %cst_20 [1] : vector<2x128xf32> to vector<2xf32>
    %45 = vector.shape_cast %44 : vector<2xf32> to vector<2x1xf32>
    %cst_21 = arith.constant 7.812500e-03 : f32
    %46 = vector.broadcast %cst_21 : f32 to vector<2x1xf32>
    %47 = arith.mulf %45, %46 : vector<2x1xf32>
    %48 = arith.mulf %41, %41 : vector<2x128xf32>
    %cst_22 = arith.constant dense<0.000000e+00> : vector<2xf32>
    %49 = vector.multi_reduction <add>, %48, %cst_22 [1] : vector<2x128xf32> to vector<2xf32>
    %50 = vector.shape_cast %49 : vector<2xf32> to vector<2x1xf32>
    %cst_23 = arith.constant 7.812500e-03 : f32
    %51 = vector.broadcast %cst_23 : f32 to vector<2x1xf32>
    %52 = arith.mulf %50, %51 : vector<2x1xf32>
    %53 = arith.mulf %47, %47 : vector<2x1xf32>
    %54 = arith.subf %52, %53 : vector<2x1xf32>
    %cst_24 = arith.constant 0.000000e+00 : f32
    %55 = vector.broadcast %cst_24 : f32 to vector<2x1xf32>
    %56 = arith.maximumf %54, %55 : vector<2x1xf32>
    %cst_25 = arith.constant 9.99999974E-6 : f32
    %57 = vector.broadcast %cst_25 : f32 to vector<2x1xf32>
    %58 = arith.addf %56, %57 : vector<2x1xf32>
    %59 = math.rsqrt %58 : vector<2x1xf32>
    %60 = vector.broadcast %59 : vector<2x1xf32> to vector<2x128xf32>
    %61 = vector.broadcast %42 : vector<1x128xf32> to vector<2x128xf32>
    %62 = arith.mulf %60, %61 : vector<2x128xf32>
    %63 = arith.mulf %41, %62 : vector<2x128xf32>
    %64 = vector.broadcast %47 : vector<2x1xf32> to vector<2x128xf32>
    %65 = arith.mulf %64, %62 : vector<2x128xf32>
    %66 = vector.broadcast %43 : vector<1x128xf32> to vector<2x128xf32>
    %67 = arith.subf %66, %65 : vector<2x128xf32>
    %68 = arith.addf %63, %67 : vector<2x128xf32>
    %cst_26 = arith.constant 0.000000e+00 : f32
    %69 = vector.broadcast %cst_26 : f32 to vector<2x128xf32>
    %70 = arith.maximumf %68, %69 : vector<2x128xf32>
    %71 = arith.truncf %70 : vector<2x128xf32> to vector<2x128xbf16>
    %c256 = arith.constant 256 : index
    %c0_27 = arith.constant 0 : index
    %72 = vector.load %arg3[%c256, %c0_27] : memref<384x128xbf16, #tpu.memory_space<vmem>>, vector<128x128xbf16>
    %cst_28 = arith.constant dense<0.000000e+00> : vector<2x128xf32>
    %73 = tpu.matmul %71, %72, %cst_28 {dimension_numbers = #tpu.dot_dimension_numbers<[1], [0], [0], [1], [0, 0, 1, 1], [], []>} : vector<2x128xbf16>, vector<128x128xbf16>, vector<2x128xf32> -> vector<2x128xf32>
    %c6 = arith.constant 6 : index
    %c0_29 = arith.constant 0 : index
    %74 = vector.load %arg4[%c6, %c0_29] : memref<8x256xf32, #tpu.memory_space<vmem>>, vector<1x128xf32>
    %75 = vector.broadcast %74 : vector<1x128xf32> to vector<2x128xf32>
    %76 = arith.addf %73, %75 : vector<2x128xf32>
    %77 = math.tanh %76 : vector<2x128xf32>
    %c0_30 = arith.constant 0 : index
    %c0_31 = arith.constant 0 : index
    %78 = vector.load %arg5[%c0_30, %c0_31] : memref<2x128xf32, #tpu.memory_space<vmem>>, vector<2x128xf32>
    tpu.vector_store %arg5[%c0_30, %c0_31], %77 {strides = array<i32>} : memref<2x128xf32, #tpu.memory_space<vmem>>, vector<2x128xf32>,
    return
  }
  func.func @transform_0(%arg0: i32) -> (i32, i32) {
    %c0_i32 = arith.constant 0 : i32
    %c0_i32_0 = arith.constant 0 : i32
    return %arg0, %c0_i32 : i32, i32
  }
  func.func @transform_1(%arg0: i32) -> (i32, i32) {
    %c0_i32 = arith.constant 0 : i32
    %c0_i32_0 = arith.constant 0 : i32
    %c0_i32_1 = arith.constant 0 : i32
    return %c0_i32, %c0_i32_0 : i32, i32
  }
  func.func @transform_2(%arg0: i32) -> (i32, i32) {
    %c0_i32 = arith.constant 0 : i32
    %c0_i32_0 = arith.constant 0 : i32
    %c0_i32_1 = arith.constant 0 : i32
    return %c0_i32, %c0_i32_0 : i32, i32
  }
  func.func @transform_3(%arg0: i32) -> (i32, i32) {
    %c0_i32 = arith.constant 0 : i32
    %c0_i32_0 = arith.constant 0 : i32
    %c0_i32_1 = arith.constant 0 : i32
    return %c0_i32, %c0_i32_0 : i32, i32
  }
  func.func @transform_4(%arg0: i32) -> (i32, i32) {
    %c0_i32 = arith.constant 0 : i32
    %c0_i32_0 = arith.constant 0 : i32
    return %arg0, %c0_i32 : i32, i32
  }
}

</mosaic_0001>

<bundles_post_ra>
// kernel: tpu_custom_call.1
= control target key start
LH: loop header
LB: loop body
LE: loop exit
PB: predicated region body
PF: predicated region fallthrough
CT: control target
= control target key end

     0   :  { %9 = vsyncpa [#allocation3], 0  ;;  %s900_s0 = inlined_call_operand.hbm [shape: f32[2,32], index: 0, kind: input, shape index: {}]   ;;  %s901_s1 = inlined_call_operand.hbm [shape: bf16[32,256], index: 1, kind: input, shape index: {}]   ;;  %s902_s2 = inlined_call_operand.hbm [shape: bf16[384,128], index: 2, kind: input, shape index: {}]   ;;  %s903_s3 = inlined_call_operand.hbm [shape: f32[8,256], index: 3, kind: input, shape index: {}]   ;;  %s904_s4 = inlined_call_operand.hbm [shape: f32[2,128], index: 4, kind: output, shape index: {}]  }
   0x1   :  { %10 = vsyncpa [#allocation6], 0 }
   0x2   :  { %11 = vsyncpa [#allocation9], 0 }
   0x3   :  { %12 = vsyncpa [#allocation4], 0  ;;  %s775_s15 = smov [#allocation5]   ;;  %s657_s19 = scalar_lea.hbm %s901_s1, 512 }
   0x4   :  { %s28_s16 = sshll.u32 %s775_s15, 4  ;;  %p658_p0 = scmp.ne.s32.totalorder %s901_s1, %s657_s19  ;;  %s29_s16 = int_to_ptr.vmem [resolvable:$true] %s28_s16 }
   0x5   :  { %p661_p1 = scmp.lt.u32.totalorder %s657_s19, %s901_s1 }
   0x7   :  { %p663_p2 = pnand %p661_p1, %p658_p0 }
   0x9   :  { %666 = shalt.err (!%p663_p2)
}
   0xa   :  { %s667_s24 = scalar_lea.vmem %s29_s16, 512  ;;  %p672_p4 = scmp.lt.s32.totalorder %s29_s16, %s29_s16 }
   0xb   :  { %p668_p3 = scmp.ne.s32.totalorder %s29_s16, %s667_s24  ;;  %p673_p5 = scmp.lt.s32.totalorder %s667_s24, %s667_s24 }
   0xd   :  { %p674_p6 = por %p673_p5, %p672_p4 }
   0xf   :  { %p675_p7 = pnand %p674_p6, %p668_p3 }
  0x11   :  { %678 = shalt.err (!%p675_p7)
}
  0x12   :  { %s776_s25 = smov 128   ;;  %s777_s26 = smov 8  }
  0x13   :  { %34 = dma.hbm_to_vmem [thread:$0]  %s901_s1, 512, %s29_s16, [#allocation6], %s776_s25, %s776_s25, %s777_s26  }
  0x14   :  { %s778_s29 = smov [#allocation2]   ;;  %s779_s5 = smov [#allocation7]  }
  0x15   :  { %s19_s30 = sshll.u32 %s778_s29, 4  ;;  %s40_s6 = sshll.u32 %s779_s5, 4  ;;  %s20_s30 = int_to_ptr.vmem [resolvable:$true] %s19_s30  ;;  %s41_s6 = int_to_ptr.vmem [resolvable:$true] %s40_s6 }
  0x16   :  { %s679_s9 = scalar_lea.hbm %s900_s0, 32 }
  0x17   :  { %p680_p8 = scmp.ne.s32.totalorder %s900_s0, %s679_s9  ;;  %p683_p9 = scmp.lt.u32.totalorder %s679_s9, %s900_s0 }
  0x19   :  { %p685_p10 = pnand %p683_p9, %p680_p8 }
  0x1b   :  { %688 = shalt.err (!%p685_p10)
}
  0x1c   :  { %s689_s1 = scalar_lea.vmem %s20_s30, 32  ;;  %p694_p12 = scmp.lt.s32.totalorder %s20_s30, %s20_s30 }
  0x1d   :  { %p690_p11 = scmp.ne.s32.totalorder %s20_s30, %s689_s1  ;;  %p695_p13 = scmp.lt.s32.totalorder %s689_s1, %s689_s1 }
  0x1f   :  { %p696_p0 = por %p695_p13, %p694_p12 }
  0x21   :  { %p697_p1 = pnand %p696_p0, %p690_p11 }
  0x23   :  { %700 = shalt.err (!%p697_p1)
}
  0x24   :  { %22 = dma.hbm_to_vmem [thread:$0]  %s900_s0, 32, %s20_s30, [#allocation3]  }
  0x25   :  { %s701_s18 = scalar_lea.hbm %s902_s2, 3072 }
  0x26   :  { %p702_p2 = scmp.ne.s32.totalorder %s902_s2, %s701_s18  ;;  %p705_p3 = scmp.lt.u32.totalorder %s701_s18, %s902_s2 }
  0x28   :  { %p707_p4 = pnand %p705_p3, %p702_p2 }
  0x2a   :  { %710 = shalt.err (!%p707_p4)
}
  0x2b   :  { %s711_s23 = scalar_lea.vmem %s41_s6, 3072  ;;  %p716_p6 = scmp.lt.s32.totalorder %s41_s6, %s41_s6 }
  0x2c   :  { %p712_p5 = scmp.ne.s32.totalorder %s41_s6, %s711_s23  ;;  %p717_p7 = scmp.lt.s32.totalorder %s711_s23, %s711_s23 }
  0x2e   :  { %p718_p8 = por %p717_p7, %p716_p6 }
  0x30   :  { %p719_p9 = pnand %p718_p8, %p712_p5 }
  0x32   :  { %722 = shalt.err (!%p719_p9)
}
  0x33   :  { %s780_s0 = smov 64   ;;  %s781_s24 = smov 4  }
  0x34   :  { %46 = dma.hbm_to_vmem [thread:$0]  %s902_s2, 3072, %s41_s6, [#allocation6], %s780_s0, %s780_s0, %s781_s24  }
  0x35   :  { %s782_s27 = smov [#allocation8]   ;;  %s723_s5 = scalar_lea.hbm %s903_s3, 256 }
  0x36   :  { %s53_s28 = sshll.u32 %s782_s27, 4  ;;  %p724_p10 = scmp.ne.s32.totalorder %s903_s3, %s723_s5  ;;  %s54_s28 = int_to_ptr.vmem [resolvable:$true] %s53_s28 }
  0x37   :  { %p727_p11 = scmp.lt.u32.totalorder %s723_s5, %s903_s3 }
  0x39   :  { %p729_p12 = pnand %p727_p11, %p724_p10 }
  0x3b   :  { %732 = shalt.err (!%p729_p12)
}
  0x3c   :  { %s733_s11 = scalar_lea.vmem %s54_s28, 256  ;;  %p738_p0 = scmp.lt.s32.totalorder %s54_s28, %s54_s28 }
  0x3d   :  { %p734_p13 = scmp.ne.s32.totalorder %s54_s28, %s733_s11  ;;  %p739_p1 = scmp.lt.s32.totalorder %s733_s11, %s733_s11 }
  0x3f   :  { %p740_p2 = por %p739_p1, %p738_p0 }
  0x41   :  { %p741_p3 = pnand %p740_p2, %p734_p13 }
  0x43   :  { %744 = shalt.err (!%p741_p3)
}
  0x44   :  { %56 = dma.hbm_to_vmem [thread:$0]  %s903_s3, 256, %s54_s28, [#allocation9]  }
  0x45   :  { %767 = dma.done.wait [#allocation3], 32  }
  0x46   :  { %768 = vsyncadd [#allocation3], 4294967264 }
  0x47   :  { %769 = dma.done.wait [#allocation6], 3584  }
  0x48   :  { %770 = vsyncadd [#allocation6], 4294963712 }
  0x49   :  { %771 = dma.done.wait [#allocation9], 256  }
  0x4a   :  { %772 = vsyncadd [#allocation9], 4294967040  ;;  %v783_v0 = vmov 0   ;;  %v621_v1 = vld [vmem:[#allocation5 + $0x4] ss:$8 sps:$4 sm:$0xff]   ;;  %vm108_vm0 = vcmask 261120   ;;  %v78_v7 = vlaneseq }
  0x4b   :  { %144 = vmatprep.mubr.bf16.mxu0 %v783_v0  ;;  %v623_v2 = vld [vmem:[#allocation5] ss:$8 sps:$4 sm:$0xff]   ;;  %112 = vmatprep.subr.bf16.mxu0 %v621_v1  ;;  %v624_v3 = vld [vmem:[#allocation5 + $0x14] ss:$8 sps:$4 sm:$0xff]   ;;  %v626_v4 = vld [vmem:[#allocation5 + $0x10] ss:$8 sps:$4 sm:$0xff]  }
  0x4c   :  { %113 = vmatpush1.bf16.msra.mxu0 %v623_v2  ;;  %v70_v5 = vld [vmem:[#allocation2] sm:$0x3]  ;;  %v79_v8 = vshrl.u32 %v78_v7, 7  ;;  %v76_v10 = vld [vmem:[#allocation8] ss:$8 sm:$0x3] }
  0x4d   :  { %114 = vmatprep.subr.bf16.mxu0 %v624_v3  ;;  %v71_v6 = vpack.c.bf16 %v70_v5, %v70_v5  ;;  %vm157_vm1 = vcmask 1041408   ;;  %v627_v28 = vld [vmem:[#allocation7 + $0x40] sm:$0xff]   ;;  %v629_v30 = vld [vmem:[#allocation7 + $0x48] sm:$0xff]   ;;  %v631_v32 = vld [vmem:[#allocation7 + $0x50] sm:$0xff]   ;;  %vm785_vm2 = vmmov 0   ;;  %s786_s3 = smov [#allocation10]  }
  0x4e   :  { %v860_v9 = vsub.s32 0, %v79_v8  ;;  %v862_v11 = vsub.s32 1, %v79_v8  ;;  %v628_v29 = vld [vmem:[#allocation7] sm:$0xff]   ;;  %558 = vmatprep.subr.bf16.mxu1 %v627_v28  ;;  %v630_v31 = vld [vmem:[#allocation7 + $0x8] sm:$0xff]   ;;  %v632_v33 = vld [vmem:[#allocation7 + $0x10] sm:$0xff]   ;;  %s518_s12 = sshll.u32 %s786_s3, 4  ;;  %s519_s12 = int_to_ptr.vmem [resolvable:$true] %s518_s12 }
  0x4f   :  { %559 = vmatpush3.bf16.msra.mxu1 %v628_v29  ;;  %v633_v34 = vld [vmem:[#allocation7 + $0x58] sm:$0xff]   ;;  %v635_v36 = vld [vmem:[#allocation7 + $0x60] sm:$0xff]   ;;  %v637_v38 = vld [vmem:[#allocation7 + $0x68] sm:$0xff]   ;;  %s745_s13 = scalar_lea.vmem %s519_s12, 32  ;;  %p750_p5 = scmp.lt.s32.totalorder %s519_s12, %s519_s12 }
  0x50   :  { %115 = vmatpush1.bf16.msra.mxu0 %v626_v4  ;;  %v81_v12 = vrot.slane %v76_v10, %v860_v9  ;;  %v85_v13 = vrot.slane %v76_v10, %v862_v11  ;;  %560 = vmatprep.subr.bf16.mxu1 %v629_v30  ;;  %v634_v35 = vld [vmem:[#allocation7 + $0x18] sm:$0xff]   ;;  %v636_v37 = vld [vmem:[#allocation7 + $0x20] sm:$0xff]   ;;  %v638_v39 = vld [vmem:[#allocation7 + $0x28] sm:$0xff]   ;;  %p746_p4 = scmp.ne.s32.totalorder %s519_s12, %s745_s13  ;;  %p751_p6 = scmp.lt.s32.totalorder %s745_s13, %s745_s13 }
  0x51   :  { %v639_v40 = vld [vmem:[#allocation7 + $0x70] sm:$0xff]   ;;  %v641_v42 = vld [vmem:[#allocation7 + $0x78] sm:$0xff]   ;;  %v154_v52 = vld [vmem:[#allocation8 + $0x1] ss:$8 sm:$0x3] }
  0x52   :  { %v640_v41 = vld [vmem:[#allocation7 + $0x30] sm:$0xff]   ;;  %v642_v43 = vld [vmem:[#allocation7 + $0x38] sm:$0xff]   ;;  %v181_v53 = vrot.slane %v154_v52, %v860_v9  ;;  %v185_v54 = vrot.slane %v154_v52, %v862_v11  ;;  %v156_v55 = vld [vmem:[#allocation8 + $0x2] ss:$8 sm:$0x3]  ;;  %p752_p7 = por %p751_p6, %p750_p5 }
  0x53   :  { %533 = vmatmul.mubr.msk.bf16.vlgmr.msra.gmra.mrb[0].mxu0 %vm108_vm0, %v71_v6  ;;  %561 = vmatpush3.bf16.msra.mxu1 %v630_v31  ;;  %v198_v58 = vrot.slane %v156_v55, %v860_v9  ;;  %v202_v59 = vrot.slane %v156_v55, %v862_v11  ;;  %v245_v10 = vld [vmem:[#allocation8 + $0x3] ss:$0 sm:$0xff] }
  0x54   :  { %562 = vmatprep.subr.bf16.mxu1 %v631_v32  ;;  %p753_p8 = pnand %p752_p7, %p746_p4 }
  0x57   :  { %563 = vmatpush3.bf16.msra.mxu1 %v632_v33 }
  0x58   :  { %564 = vmatprep.subr.bf16.mxu1 %v633_v34 }
  0x5b   :  { %565 = vmatpush3.bf16.msra.mxu1 %v634_v35 }
  0x5c   :  { %566 = vmatprep.subr.bf16.mxu1 %v635_v36  ;;  %v382_v36 = vld [vmem:[#allocation8 + $0x4] ss:$0 sm:$0xff] }
  0x5f   :  { %567 = vmatpush3.bf16.msra.mxu1 %v636_v37 }
  0x60   :  { %568 = vmatprep.subr.bf16.mxu1 %v637_v38 }
  0x63   :  { %569 = vmatpush3.bf16.msra.mxu1 %v638_v39  ;;  %v383_v39 = vld [vmem:[#allocation8 + $0x5] ss:$0 sm:$0xff] }
  0x64   :  { %570 = vmatprep.subr.bf16.mxu1 %v639_v40 }
  0x67   :  { %571 = vmatpush3.bf16.msra.mxu1 %v640_v41 }
  0x68   :  { %572 = vmatprep.subr.bf16.mxu1 %v641_v42 }
  0x6b   :  { %573 = vmatpush3.bf16.msra.mxu1 %v642_v43 }
 0x126   :  { %v146_v14 = vpop.f32.mrb[0].mxu0 }
 0x127   :  { %v866_v15 = vadd.f32 %v146_v14, %v81_v12  ;;  %v148_v16 = vpop.f32.mrb[1].mxu0 }
 0x128   :  { %v868_v17 = vadd.f32 %v148_v16, %v85_v13  ;;  %v150_v18 = vpop.f32.mrb[2].mxu0 }
 0x129   :  { %v151_v19 = vpop.f32.mrb[3].mxu0  ;;  %v158_v20 = vsel %vm157_vm1, %v866_v15, 0.0  ;;  %v164_v21 = vmul.f32 %v866_v15, %v866_v15 }
 0x12a   :  { %v159_v22 = vsel %vm157_vm1, %v868_v17, 0.0  ;;  %v165_v23 = vmul.f32 %v868_v17, %v868_v17  ;;  %v643_v19 = vld [vmem:[#allocation7 + $0x80] sm:$0xff]  }
 0x12b   :  { %v160_v24 = vadd.f32 %v159_v22, %v158_v20  ;;  %v166_v25 = vsel %vm157_vm1, %v164_v21, 0.0  ;;  %v784_v20 = vmov 0.0   ;;  %v644_v21 = vld [vmem:[#allocation7 + $0x88] sm:$0xff]   ;;  %v645_v22 = vld [vmem:[#allocation7 + $0x90] sm:$0xff]  }
 0x12c   :  { %v167_v26 = vsel %vm157_vm1, %v165_v23, 0.0  ;;  %589 = vmatprep.subr.bf16.mxu0 %v784_v20  ;;  %v646_v23 = vld [vmem:[#allocation7 + $0x98] sm:$0xff]   ;;  %605 = vmatprep.mubr.msk.bf16.mxu0 %vm785_vm2, %v784_v20 }
 0x12d   :  { %161 = vadd.xlane.f32.xlu0 %v160_v24  ;;  %v168_v27 = vadd.f32 %v167_v26, %v166_v25  ;;  %590 = vmatpush3.bf16.msra.mxu0 %v643_v19  ;;  %v647_v24 = vld [vmem:[#allocation7 + $0xa0] sm:$0xff]   ;;  %v648_v25 = vld [vmem:[#allocation7 + $0xa8] sm:$0xff]   ;;  %v649_v26 = vld [vmem:[#allocation7 + $0xb0] sm:$0xff]  }
 0x12e   :  { %591 = vmatprep.subr.bf16.mxu0 %v784_v20 }
 0x131   :  { %169 = vadd.xlane.f32.xlu0 %v168_v27  ;;  %592 = vmatpush3.bf16.msra.mxu0 %v644_v21  ;;  %v650_v27 = vld [vmem:[#allocation7 + $0xb8] sm:$0xff]  }
 0x132   :  { %593 = vmatprep.subr.bf16.mxu0 %v784_v20 }
 0x135   :  { %594 = vmatpush3.bf16.msra.mxu0 %v645_v22 }
 0x136   :  { %595 = vmatprep.subr.bf16.mxu0 %v784_v20 }
 0x139   :  { %596 = vmatpush3.bf16.msra.mxu0 %v646_v23 }
 0x13a   :  { %597 = vmatprep.subr.bf16.mxu0 %v784_v20 }
 0x13d   :  { %598 = vmatpush3.bf16.msra.mxu0 %v647_v24 }
 0x13e   :  { %599 = vmatprep.subr.bf16.mxu0 %v784_v20 }
 0x141   :  { %600 = vmatpush3.bf16.msra.mxu0 %v648_v25 }
 0x142   :  { %601 = vmatprep.subr.bf16.mxu0 %v784_v20 }
 0x145   :  { %602 = vmatpush3.bf16.msra.mxu0 %v649_v26 }
 0x146   :  { %603 = vmatprep.subr.bf16.mxu0 %v784_v20 }
 0x149   :  { %604 = vmatpush3.bf16.msra.mxu0 %v650_v27 }
 0x1ba   :  { %v162_v44 = vpop.xlane.xlu0 %161 }
 0x1bb   :  { %v163_v45 = vmul.f32 0.00390625, %v162_v44 }
 0x1bd   :  { %v172_v47 = vmul.f32 %v163_v45, %v163_v45 }
 0x1be   :  { %v170_v46 = vpop.xlane.xlu0 %169 }
 0x1bf   :  { %v171_v48 = vmul.f32 0.00390625, %v170_v46  ;;  %v421_v46 = vld [vmem:[#allocation8 + $0x6] ss:$0 sm:$0xff] }
 0x1c1   :  { %v173_v49 = vsub.f32 %v171_v48, %v172_v47 }
 0x1c3   :  { %v174_v50 = vmax.f32 %v173_v49, 0.0 }
 0x1c5   :  { %v175_v51 = vadd.f32 1e-05, %v174_v50 }
 0x1c7   :  { %651 = vrsqrt.f32 %v175_v51 }
 0x1d1   :  { %v652_v56 = vpop.eup %651 }
 0x1d2   :  { %v189_v57 = vmul.f32 %v652_v56, %v185_v54  ;;  %v188_v60 = vmul.f32 %v652_v56, %v181_v53 }
 0x1d4   :  { %v193_v61 = vmul.f32 %v189_v57, %v163_v45  ;;  %v192_v62 = vmul.f32 %v188_v60, %v163_v45  ;;  %v191_v63 = vmul.f32 %v189_v57, %v868_v17  ;;  %v190_v1 = vmul.f32 %v188_v60, %v866_v15 }
 0x1d6   :  { %v206_v0 = vsub.f32 %v202_v59, %v193_v61  ;;  %v205_v2 = vsub.f32 %v198_v58, %v192_v62 }
 0x1d8   :  { %v208_v3 = vadd.f32 %v206_v0, %v191_v63  ;;  %v207_v4 = vadd.f32 %v205_v2, %v190_v1 }
 0x1da   :  { %v210_v5 = vmax.f32 %v208_v3, 0.0  ;;  %v209_v6 = vmax.f32 %v207_v4, 0.0 }
 0x1dc   :  { %v212_v7 = vpack.c.bf16 %v210_v5, %v210_v5  ;;  %v211_v8 = vpack.c.bf16 %v209_v6, %v209_v6 }
 0x1de   :  { %374 = vmatprep.mubr.bf16.mxu1 %v212_v7 }
 0x1df   :  { %375 = vmatmul.mubr.bf16.vlgmr.msra.gmra.mrb[0].mxu1 %v211_v8 }
 0x2b2   :  { %v574_v9 = vpop.f32.mrb[0].mxu1 }
 0x2b3   :  { %v575_v11 = vpop.f32.mrb[1].mxu1 }
 0x2b4   :  { %v576_v12 = vadd.f32 %v575_v11, %v574_v9  ;;  %v577_v13 = vpop.f32.mrb[2].mxu1 }
 0x2b5   :  { %v578_v14 = vpop.f32.mrb[3].mxu1 }
 0x2b6   :  { %v377_v16 = vadd.f32 %v576_v12, %v245_v10 }
 0x2b8   :  { %v384_v17 = vsel %vm157_vm1, %v377_v16, 0.0  ;;  %v388_v18 = vmul.f32 %v377_v16, %v377_v16 }
 0x2b9   :  { %385 = vadd.xlane.f32.xlu1 %v384_v17 }
 0x2ba   :  { %v389_v15 = vsel %vm157_vm1, %v388_v18, 0.0 }
 0x2bd   :  { %390 = vadd.xlane.f32.xlu1 %v389_v15 }
 0x346   :  { %v386_v28 = vpop.xlane.xlu1 %385 }
 0x347   :  { %v387_v29 = vmul.f32 0.0078125, %v386_v28 }
 0x349   :  { %v393_v31 = vmul.f32 %v387_v29, %v387_v29 }
 0x34a   :  { %v391_v30 = vpop.xlane.xlu1 %390 }
 0x34b   :  { %v392_v32 = vmul.f32 0.0078125, %v391_v30 }
 0x34d   :  { %v394_v33 = vsub.f32 %v392_v32, %v393_v31 }
 0x34f   :  { %v395_v34 = vmax.f32 %v394_v33, 0.0 }
 0x351   :  { %v396_v35 = vadd.f32 1e-05, %v395_v34 }
 0x353   :  { %653 = vrsqrt.f32 %v396_v35 }
 0x35d   :  { %v654_v37 = vpop.eup %653 }
 0x35e   :  { %v398_v38 = vmul.f32 %v654_v37, %v382_v36 }
 0x360   :  { %v400_v40 = vmul.f32 %v398_v38, %v387_v29  ;;  %v399_v41 = vmul.f32 %v398_v38, %v377_v16 }
 0x362   :  { %v401_v42 = vsub.f32 %v383_v39, %v400_v40 }
 0x364   :  { %v402_v43 = vadd.f32 %v401_v42, %v399_v41 }
 0x366   :  { %v403_v44 = vmax.f32 %v402_v43, 0.0 }
 0x368   :  { %v404_v45 = vpack.c.bf16 %v403_v44, %v403_v44 }
 0x36a   :  { %606 = vmatmul.mubr.bf16.vlgmr.msra.gmra.mrb[4].mxu0 %v404_v45 }
 0x43d   :  { %v504_v47 = vpop.f32.mrb[4].mxu0 }
 0x43e   :  { %v505_v48 = vadd.f32 %v504_v47, %v421_v46  ;;  %v607_v49 = vpop.f32.mrb[5].mxu0 }
 0x43f   :  { %v507_v50 = vpop.f32.mrb[6].mxu0 }
 0x440   :  { %655 = vtanh.f32 %v505_v48  ;;  %v608_v51 = vpop.f32.mrb[7].mxu0 }
 0x44a   :  { %v656_v52 = vpop.eup %655 }
 0x44b   :  { %511 = vst [vmem:[#allocation10] sm:$0x3] %v656_v52 }
 0x44c   :  { %756 = shalt.err (!%p753_p8)
}
 0x44d   :  { %s757_s15 = scalar_lea.hbm %s904_s4, 32 }
 0x44e   :  { %p758_p9 = scmp.ne.s32.totalorder %s904_s4, %s757_s15  ;;  %p761_p10 = scmp.lt.u32.totalorder %s757_s15, %s904_s4 }
 0x450   :  { %p763_p11 = pnand %p761_p10, %p758_p9 }
 0x452   :  { %766 = shalt.err (!%p763_p11)
}
 0x453   :  { %521 = dma.vmem_to_hbm [thread:$0]  %s519_s12, 32, %s904_s4, [#allocation4]  }
 0x454   :  { %773 = dma.done.wait [#allocation4], 32  }
 0x455   :  { %774 = vsyncadd [#allocation4], 4294967264 }
 0x456   :  { %525 = vsyncpa [#allocation3], 1 }
 0x457   :  { %526 = vsyncpa [#allocation6], 1 }
 0x458   :  { %527 = vsyncpa [#allocation9], 1 }
 0x459   :  { %528 = vsyncpa [#allocation4], 1 }

</bundles_post_ra>
